<compile_context>
chip_gen: v6e
topology: v6e:2x2x1
jax: 0.10.0
libtpu: 0.0.40
codegen_flags: <defaults>
</compile_context>

<pallas_src>
import functools

import jax
import jax.numpy as jnp
from jax.experimental import pallas as pl
from jax.experimental.pallas import tpu as pltpu


# ----------------------------------------------------------------------------
# VMEM / tiling helpers
# ----------------------------------------------------------------------------
def _cdiv(a, b):
    return (a + b - 1) // b


def _round_up(x, m):
    return ((x + m - 1) // m) * m


def _vmem_capacity_bytes():
    try:
        cap = int(pltpu.get_tpu_info().vmem_capacity_bytes)
        if cap > 0:
            return cap
    except Exception:
        pass
    return 64 * 1024 * 1024  # conservative fallback (v7x-sized)


def _tile_rows(n, d, itemsize, bytes_per_row):
    """Row tile (multiple of the sublane packing, <= 1024) within a VMEM budget."""
    row_align = max(8, 32 // itemsize)          # f32: 8, bf16: 16, int8/fp8: 32
    budget = _vmem_capacity_bytes() // 4        # headroom for double buffers etc.
    tile = budget // max(1, bytes_per_row)
    tile = max(row_align, min(1024, tile))      # >1024 rows buys <1% (measured)
    tile = (tile // row_align) * row_align
    tile = min(tile, _round_up(n, row_align))
    if tile >= n:
        tile = n                                # full-dim block is always legal
    return tile


# ----------------------------------------------------------------------------
# Kernels
# ----------------------------------------------------------------------------
def _bn_stats_kernel(x_ref, sum_ref, sq_ref, *, n, tile, tiles_per_part):
    # Grid: (P, tiles_per_part).  Each partition p owns its own (1, d)
    # accumulator row, so the leading axis can be "parallel" (2 TCs on v7x).
    p = pl.program_id(0)
    t = pl.program_id(1)

    @pl.when(t == 0)
    def _init():
        sum_ref[...] = jnp.zeros_like(sum_ref)
        sq_ref[...] = jnp.zeros_like(sq_ref)

    # Mask tail rows (>= n) in-kernel: no wrapper-side padding copy needed.
    row0 = (p * tiles_per_part + t) * tile
    local = jax.lax.broadcasted_iota(jnp.int32, (tile, 1), 0)
    mask = (row0 + local) < n
    x = jnp.where(mask, x_ref[...].astype(jnp.float32), 0.0)

    sum_ref[...] += jnp.sum(x, axis=0, keepdims=True)
    sq_ref[...] += jnp.sum(x * x, axis=0, keepdims=True)


def _bn_apply_kernel(x_ref, s_ref, sq_ref, g_ref, b_ref, o_ref, *, n, eps):
    # Fold the tiny mean/var/scale/shift epilogue into the normalize pass:
    # recomputed per tile from the resident (P, d) partial sums (cheap (1, d)
    # VPU/EUP work, hidden under the HBM-bound stream).
    s = jnp.sum(s_ref[...].astype(jnp.float32), axis=0, keepdims=True)
    sq = jnp.sum(sq_ref[...].astype(jnp.float32), axis=0, keepdims=True)
    inv_n = 1.0 / n
    mean = s * inv_n
    var = jnp.maximum(sq * inv_n - mean * mean, 0.0)   # clamp: cancellation guard
    scale = g_ref[...].astype(jnp.float32) * jax.lax.rsqrt(var + eps)
    shift = b_ref[...].astype(jnp.float32) - mean * scale
    x = x_ref[...].astype(jnp.float32)
    o_ref[...] = (x * scale + shift).astype(o_ref.dtype)


def _bn_fused_kernel(x_ref, g_ref, b_ref, o_ref, *, n, eps):
    # Whole slab resident in VMEM: 2-slab HBM floor (one read, one write).
    x = x_ref[...].astype(jnp.float32)
    s = jnp.sum(x, axis=0, keepdims=True)
    sq = jnp.sum(x * x, axis=0, keepdims=True)
    inv_n = 1.0 / n
    mean = s * inv_n
    var = jnp.maximum(sq * inv_n - mean * mean, 0.0)
    scale = g_ref[...].astype(jnp.float32) * jax.lax.rsqrt(var + eps)
    shift = b_ref[...].astype(jnp.float32) - mean * scale
    o_ref[...] = (x * scale + shift).astype(o_ref.dtype)


def _ln_kernel(x_ref, g_ref, b_ref, o_ref, *, eps):
    # Row-wise stats over the lane (feature) dim.  Tail rows of a partial last
    # block compute on unspecified data; Pallas masks the OOB writeback.
    x = x_ref[...].astype(jnp.float32)
    mean = jnp.mean(x, axis=-1, keepdims=True)
    var = jnp.mean(jnp.square(x - mean), axis=-1, keepdims=True)  # biased var
    inv = jax.lax.rsqrt(var + eps)
    y = (x - mean) * inv
    y = y * g_ref[...].astype(jnp.float32) + b_ref[...].astype(jnp.float32)
    o_ref[...] = y.astype(o_ref.dtype)


# ----------------------------------------------------------------------------
# Wrapper
# ----------------------------------------------------------------------------
def patch_norm(x, gamma, beta, *, norm_type="bn1d", eps=1e-5,
               force_two_pass=False):
    """Pallas equivalent of the PyTorch `patch_norm` forward.

    x:     (b, p, d)
    gamma: (d,)  scale (BatchNorm1d.weight / LayerNorm.weight)
    beta:  (d,)  shift (BatchNorm1d.bias   / LayerNorm.bias)
    """
    b, p, d = x.shape
    n = b * p
    dtype = x.dtype
    itemsize = jnp.dtype(dtype).itemsize
    cap = _vmem_capacity_bytes()

    x2d = x.reshape(n, d)
    g2d = gamma.reshape(1, d)
    b2d = beta.reshape(1, d)

    if norm_type == "bn1d":
        # Per-element VMEM for the fused path: x + out (native dtype) plus two
        # f32 elementwise temporaries.
        fused_bytes = n * d * (2 * itemsize + 8) + (2 << 20)
        use_fused = (fused_bytes <= cap // 4) and not force_two_pass

        if use_fused:
            vmem_limit = int(min(cap * 7 // 8, max(32 << 20, 3 * fused_bytes)))
            out2d = pl.pallas_call(
                functools.partial(_bn_fused_kernel, n=n, eps=eps),
                out_shape=jax.ShapeDtypeStruct((n, d), dtype),
                grid=(1,),
                in_specs=[pl.BlockSpec((n, d), lambda i: (0, 0)),
                          pl.BlockSpec((1, d), lambda i: (0, 0)),
                          pl.BlockSpec((1, d), lambda i: (0, 0))],
                out_specs=pl.BlockSpec((n, d), lambda i: (0, 0)),
                compiler_params=pltpu.CompilerParams(
                    dimension_semantics=("arbitrary",),
                    vmem_limit_bytes=vmem_limit),
                cost_estimate=pl.CostEstimate(
                    flops=7 * n * d, transcendentals=d,
                    bytes_accessed=2 * n * d * itemsize),
            )(x2d, g2d, b2d)
        else:
            # ---- Phase 1: per-feature sum / sum-of-squares (row reduction) ----
            # Larger tile: no tiled output, only the resident accumulators.
            tile_s = _tile_rows(n, d, itemsize, bytes_per_row=2 * d * itemsize)
            n_tiles_s = _cdiv(n, tile_s)
            # Split into 2 partitions when it divides evenly so the "parallel"
            # leading axis can engage both v7x TensorCores (no-op on 1-TC chips).
            n_parts = 2 if (n_tiles_s >= 2 and n_tiles_s % 2 == 0) else 1
            tpp = n_tiles_s // n_parts
            vmem_s = int(min(cap, max(
                32 << 20,
                2 * tile_s * d * itemsize + 2 * tile_s * d * 4 + (4 << 20))))

            s_parts, sq_parts = pl.pallas_call(
                functools.partial(_bn_stats_kernel, n=n, tile=tile_s,
                                  tiles_per_part=tpp),
                out_shape=(jax.ShapeDtypeStruct((n_parts, d), jnp.float32),
                           jax.ShapeDtypeStruct((n_parts, d), jnp.float32)),
                grid=(n_parts, tpp),
                in_specs=[pl.BlockSpec((tile_s, d),
                                       lambda pi, ti: (pi * tpp + ti, 0))],
                out_specs=(pl.BlockSpec((1, d), lambda pi, ti: (pi, 0)),
                           pl.BlockSpec((1, d), lambda pi, ti: (pi, 0))),
                compiler_params=pltpu.CompilerParams(
                    dimension_semantics=("parallel", "arbitrary"),
                    vmem_limit_bytes=vmem_s),
                cost_estimate=pl.CostEstimate(
                    flops=3 * n * d, transcendentals=0,
                    bytes_accessed=n * d * itemsize + 2 * n_parts * d * 4),
            )(x2d)

            # ---- Phase 2: tiled, fully parallel normalize (epilogue fused) ----
            tile_a = _tile_rows(n, d, itemsize, bytes_per_row=4 * d * itemsize)
            vmem_a = int(min(cap, max(
                32 << 20,
                4 * tile_a * d * itemsize + 2 * tile_a * d * 4 + (4 << 20))))
            out2d = pl.pallas_call(
                functools.partial(_bn_apply_kernel, n=n, eps=eps),
                out_shape=jax.ShapeDtypeStruct((n, d), dtype),
                grid=(_cdiv(n, tile_a),),
                in_specs=[pl.BlockSpec((tile_a, d), lambda i: (i, 0)),
                          pl.BlockSpec((n_parts, d), lambda i: (0, 0)),
                          pl.BlockSpec((n_parts, d), lambda i: (0, 0)),
                          pl.BlockSpec((1, d), lambda i: (0, 0)),
                          pl.BlockSpec((1, d), lambda i: (0, 0))],
                out_specs=pl.BlockSpec((tile_a, d), lambda i: (i, 0)),
                compiler_params=pltpu.CompilerParams(
                    dimension_semantics=("parallel",),
                    vmem_limit_bytes=vmem_a),
                cost_estimate=pl.CostEstimate(
                    flops=2 * n * d, transcendentals=0,
                    bytes_accessed=2 * n * d * itemsize),
            )(x2d, s_parts, sq_parts, g2d, b2d)

    elif norm_type == "ln":
        tile_l = _tile_rows(n, d, itemsize, bytes_per_row=4 * d * itemsize)
        vmem_l = int(min(cap, max(
            32 << 20,
            4 * tile_l * d * itemsize + 2 * tile_l * d * 4 + (4 << 20))))
        out2d = pl.pallas_call(
            functools.partial(_ln_kernel, eps=eps),
            out_shape=jax.ShapeDtypeStruct((n, d), dtype),
            grid=(_cdiv(n, tile_l),),
            in_specs=[pl.BlockSpec((tile_l, d), lambda i: (i, 0)),
                      pl.BlockSpec((1, d), lambda i: (0, 0)),
                      pl.BlockSpec((1, d), lambda i: (0, 0))],
            out_specs=pl.BlockSpec((tile_l, d), lambda i: (i, 0)),
            compiler_params=pltpu.CompilerParams(
                dimension_semantics=("parallel",),
                vmem_limit_bytes=vmem_l),
            cost_estimate=pl.CostEstimate(
                flops=7 * n * d, transcendentals=n,
                bytes_accessed=2 * n * d * itemsize),
        )(x2d, g2d, b2d)
    else:
        raise ValueError("norm_type should be bn1d or ln")

    return out2d.reshape(b, p, d)


# ----------------------------------------------------------------------------
# Pure-JAX references (PyTorch semantics)
# ----------------------------------------------------------------------------
def _ref_bn1d(x, gamma, beta, eps):
    mean = jnp.mean(x, axis=(0, 1), keepdims=True)
    var = jnp.mean(jnp.square(x - mean), axis=(0, 1), keepdims=True)
    return (x - mean) * jax.lax.rsqrt(var + eps) * gamma + beta


def _ref_ln(x, gamma, beta, eps):
    mean = jnp.mean(x, axis=-1, keepdims=True)
    var = jnp.mean(jnp.square(x - mean), axis=-1, keepdims=True)
    return (x - mean) * jax.lax.rsqrt(var + eps) * gamma + beta


if __name__ == "__main__":
    eps = 1e-5
    d_model = 32
    # nn.BatchNorm1d / nn.LayerNorm default parameter init.
    gamma = jnp.ones((d_model,), jnp.float32)
    beta = jnp.zeros((d_model,), jnp.float32)

    # Case 1: aligned rows (b*p = 16): fused BN path, single-tile LN.
    x1 = jax.random.normal(jax.random.PRNGKey(0), (2, 8, d_model), dtype=jnp.float32)
    y_bn = jax.block_until_ready(patch_norm(x1, gamma, beta, norm_type="bn1d", eps=eps))
    y_ln = jax.block_until_ready(patch_norm(x1, gamma, beta, norm_type="ln", eps=eps))
    assert y_bn.shape == x1.shape and y_ln.shape == x1.shape
    assert jnp.allclose(y_bn, _ref_bn1d(x1, gamma, beta, eps), atol=2e-5, rtol=2e-5)
    assert jnp.allclose(y_ln, _ref_ln(x1, gamma, beta, eps), atol=2e-5, rtol=2e-5)

    # Case 2: odd row count (b*p = 15): full-dim (unaligned) blocks.
    x2 = jax.random.normal(jax.random.PRNGKey(1), (3, 5, d_model), dtype=jnp.float32)
    y_bn2 = jax.block_until_ready(patch_norm(x2, gamma, beta, norm_type="bn1d", eps=eps))
    y_ln2 = jax.block_until_ready(patch_norm(x2, gamma, beta, norm_type="ln", eps=eps))
    assert y_bn2.shape == x2.shape and y_ln2.shape == x2.shape
    assert jnp.allclose(y_bn2, _ref_bn1d(x2, gamma, beta, eps), atol=2e-5, rtol=2e-5)
    assert jnp.allclose(y_ln2, _ref_ln(x2, gamma, beta, eps), atol=2e-5, rtol=2e-5)

    # Case 3: b*p = 4000 exercises the two-pass BN path (forced), the 2-way
    # partitioned stats grid, the in-kernel tail masking, and partial tiles.
    x3 = jax.random.normal(jax.random.PRNGKey(2), (10, 400, d_model), dtype=jnp.float32)
    y_bn3 = jax.block_until_ready(
        patch_norm(x3, gamma, beta, norm_type="bn1d", eps=eps, force_two_pass=True))
    y_ln3 = jax.block_until_ready(patch_norm(x3, gamma, beta, norm_type="ln", eps=eps))
    assert y_bn3.shape == x3.shape and y_ln3.shape == x3.shape
    assert jnp.allclose(y_bn3, _ref_bn1d(x3, gamma, beta, eps), atol=1e-4, rtol=1e-4)
    assert jnp.allclose(y_ln3, _ref_ln(x3, gamma, beta, eps), atol=1e-4, rtol=1e-4)

    print("KERNEL_OK")
</pallas_src>

<mosaic_0001>
module attributes {stable_mosaic.version = 11 : i64} {
  func.func @_bn_fused_kernel(%arg0: i32, %arg1: memref<16x32xf32, #tpu.memory_space<vmem>>, %arg2: memref<1x32xf32, #tpu.memory_space<vmem>>, %arg3: memref<1x32xf32, #tpu.memory_space<vmem>>, %arg4: memref<16x32xf32, #tpu.memory_space<vmem>>) attributes {dimension_semantics = [#tpu.dimension_semantics<arbitrary>], iteration_bounds = array<i64: 1>, scalar_prefetch = 0 : i64, scratch_operands = 0 : i64, tpu.core_type = #tpu.core_type<tc>, window_params = [{pipeline_mode = #tpu.pipeline_mode<synchronous>, transform_indices = @transform_0, window_bounds = array<i64: 16, 32>}, {pipeline_mode = #tpu.pipeline_mode<synchronous>, transform_indices = @transform_1, window_bounds = array<i64: 1, 32>}, {pipeline_mode = #tpu.pipeline_mode<synchronous>, transform_indices = @transform_2, window_bounds = array<i64: 1, 32>}, {pipeline_mode = #tpu.pipeline_mode<synchronous>, transform_indices = @transform_3, window_bounds = array<i64: 16, 32>}]} {
    %c0 = arith.constant 0 : index
    %c0_0 = arith.constant 0 : index
    %0 = vector.load %arg1[%c0, %c0_0] : memref<16x32xf32, #tpu.memory_space<vmem>>, vector<16x32xf32>
    %cst = arith.constant dense<0.000000e+00> : vector<32xf32>
    %1 = vector.multi_reduction <add>, %0, %cst [0] : vector<16x32xf32> to vector<32xf32>
    %2 = vector.shape_cast %1 : vector<32xf32> to vector<1x32xf32>
    %3 = arith.mulf %0, %0 : vector<16x32xf32>
    %cst_1 = arith.constant dense<0.000000e+00> : vector<32xf32>
    %4 = vector.multi_reduction <add>, %3, %cst_1 [0] : vector<16x32xf32> to vector<32xf32>
    %5 = vector.shape_cast %4 : vector<32xf32> to vector<1x32xf32>
    %cst_2 = arith.constant 6.250000e-02 : f32
    %6 = vector.broadcast %cst_2 : f32 to vector<1x32xf32>
    %7 = arith.mulf %2, %6 : vector<1x32xf32>
    %cst_3 = arith.constant 6.250000e-02 : f32
    %8 = vector.broadcast %cst_3 : f32 to vector<1x32xf32>
    %9 = arith.mulf %5, %8 : vector<1x32xf32>
    %10 = arith.mulf %7, %7 : vector<1x32xf32>
    %11 = arith.subf %9, %10 : vector<1x32xf32>
    %cst_4 = arith.constant 0.000000e+00 : f32
    %12 = vector.broadcast %cst_4 : f32 to vector<1x32xf32>
    %13 = arith.maximumf %11, %12 : vector<1x32xf32>
    %c0_5 = arith.constant 0 : index
    %c0_6 = arith.constant 0 : index
    %14 = vector.load %arg2[%c0_5, %c0_6] : memref<1x32xf32, #tpu.memory_space<vmem>>, vector<1x32xf32>
    %cst_7 = arith.constant 9.99999974E-6 : f32
    %15 = vector.broadcast %cst_7 : f32 to vector<1x32xf32>
    %16 = arith.addf %13, %15 : vector<1x32xf32>
    %17 = math.rsqrt %16 : vector<1x32xf32>
    %18 = arith.mulf %14, %17 : vector<1x32xf32>
    %c0_8 = arith.constant 0 : index
    %c0_9 = arith.constant 0 : index
    %19 = vector.load %arg3[%c0_8, %c0_9] : memref<1x32xf32, #tpu.memory_space<vmem>>, vector<1x32xf32>
    %20 = arith.mulf %7, %18 : vector<1x32xf32>
    %21 = arith.subf %19, %20 : vector<1x32xf32>
    %22 = vector.broadcast %18 : vector<1x32xf32> to vector<16x32xf32>
    %23 = arith.mulf %0, %22 : vector<16x32xf32>
    %24 = vector.broadcast %21 : vector<1x32xf32> to vector<16x32xf32>
    %25 = arith.addf %23, %24 : vector<16x32xf32>
    %c0_10 = arith.constant 0 : index
    %c0_11 = arith.constant 0 : index
    %26 = vector.load %arg4[%c0_10, %c0_11] : memref<16x32xf32, #tpu.memory_space<vmem>>, vector<16x32xf32>
    tpu.vector_store %arg4[%c0_10, %c0_11], %25 {strides = array<i32>} : memref<16x32xf32, #tpu.memory_space<vmem>>, vector<16x32xf32>,
    return
  }
  func.func @transform_0(%arg0: i32) -> (i32, i32) {
    %c0_i32 = arith.constant 0 : i32
    %c0_i32_0 = arith.constant 0 : i32
    %c0_i32_1 = arith.constant 0 : i32
    return %c0_i32, %c0_i32_0 : i32, i32
  }
  func.func @transform_1(%arg0: i32) -> (i32, i32) {
    %c0_i32 = arith.constant 0 : i32
    %c0_i32_0 = arith.constant 0 : i32
    %c0_i32_1 = arith.constant 0 : i32
    return %c0_i32, %c0_i32_0 : i32, i32
  }
  func.func @transform_2(%arg0: i32) -> (i32, i32) {
    %c0_i32 = arith.constant 0 : i32
    %c0_i32_0 = arith.constant 0 : i32
    %c0_i32_1 = arith.constant 0 : i32
    return %c0_i32, %c0_i32_0 : i32, i32
  }
  func.func @transform_3(%arg0: i32) -> (i32, i32) {
    %c0_i32 = arith.constant 0 : i32
    %c0_i32_0 = arith.constant 0 : i32
    %c0_i32_1 = arith.constant 0 : i32
    return %c0_i32, %c0_i32_0 : i32, i32
  }
}

</mosaic_0001>

<bundles_post_ra>
// kernel: tpu_custom_call.1
= control target key start
LH: loop header
LB: loop body
LE: loop exit
PB: predicated region body
PF: predicated region fallthrough
CT: control target
= control target key end

     0   :  { %8 = vsyncpa [#allocation3], 0  ;;  %s197_s0 = inlined_call_operand.hbm [shape: f32[16,32], index: 0, kind: input, shape index: {}]   ;;  %s198_s1 = inlined_call_operand.vmem [shape: f32[1,32], index: 1, kind: input, shape index: {}]   ;;  %s199_s2 = inlined_call_operand.vmem [shape: f32[1,32], index: 2, kind: input, shape index: {}]   ;;  %s200_s3 = inlined_call_operand.hbm [shape: f32[16,32], index: 3, kind: output, shape index: {}]  }
   0x1   :  { %9 = vsyncpa [#allocation4], 0  ;;  %s149_s12 = smov [#allocation2]  }
   0x2   :  { %s15_s13 = sshll.u32 %s149_s12, 4  ;;  %s16_s13 = int_to_ptr.vmem [resolvable:$true] %s15_s13 }
   0x3   :  { %s113_s14 = scalar_lea.vmem %s16_s13, 256  ;;  %p118_p1 = scmp.lt.s32.totalorder %s16_s13, %s16_s13 }
   0x4   :  { %p114_p0 = scmp.ne.s32.totalorder %s16_s13, %s113_s14  ;;  %p119_p2 = scmp.lt.s32.totalorder %s113_s14, %s113_s14 }
   0x6   :  { %p120_p3 = por %p119_p2, %p118_p1 }
   0x8   :  { %p121_p4 = pnand %p120_p3, %p114_p0 }
   0xa   :  { %124 = shalt.err (!%p121_p4)
}
   0xb   :  { %s150_s15 = smov 128   ;;  %s151_s16 = smov 8  }
   0xc   :  { %21 = dma.hbm_to_vmem [thread:$0]  %s197_s0, 256, %s16_s13, [#allocation3], %s150_s15, %s150_s15, %s151_s16  }
   0xd   :  { %145 = dma.done.wait [#allocation3], 256  }
   0xe   :  { %146 = vsyncadd [#allocation3], 4294967040  ;;  %vm31_vm0 = vcmask 261120   ;;  %v29_v0 = vld [vmem:[#allocation2] sm:$0xff]  ;;  %v30_v1 = vld [vmem:[#allocation2 + $0x8] sm:$0xff]  ;;  %v65_v28 = vlaneseq  ;;  %s152_s22 = smov [#allocation5]  }
   0xf   :  { %v32_v2 = vsel %vm31_vm0, %v29_v0, 0.0  ;;  %v33_v3 = vsel %vm31_vm0, %v30_v1, 0.0  ;;  %v41_v4 = vmul.f32 %v29_v0, %v29_v0  ;;  %v42_v5 = vmul.f32 %v30_v1, %v30_v1  ;;  %v57_v30 = vld [vmem:[%s198_s1] sm:$0x1]  ;;  %s87_s23 = sshll.u32 %s152_s22, 4  ;;  %s88_s23 = int_to_ptr.vmem [resolvable:$true] %s87_s23 }
  0x10   :  { %v34_v6 = vadd.f32 %v33_v3, %v32_v2  ;;  %v66_v29 = vshrl.u32 %v65_v28, 7  ;;  %v61_v34 = vld [vmem:[%s199_s2] sm:$0x1]  ;;  %s125_s1 = scalar_lea.vmem %s88_s23, 256  ;;  %p130_p6 = scmp.lt.s32.totalorder %s88_s23, %s88_s23 }
  0x11   :  { %v43_v7 = vsel %vm31_vm0, %v41_v4, 0.0  ;;  %v44_v8 = vsel %vm31_vm0, %v42_v5, 0.0  ;;  %p126_p5 = scmp.ne.s32.totalorder %s88_s23, %s125_s1  ;;  %p131_p7 = scmp.lt.s32.totalorder %s125_s1, %s125_s1 }
  0x12   :  { %v35_v9 = vrot.slane %v34_v6, 4  ;;  %v45_v10 = vadd.f32 %v44_v8, %v43_v7  ;;  %v67_v31 = vsub.s32 0, %v66_v29 }
  0x13   :  { %p132_p8 = por %p131_p7, %p130_p6 }
  0x14   :  { %v36_v11 = vadd.f32 %v35_v9, %v34_v6  ;;  %v46_v12 = vrot.slane %v45_v10, 4 }
  0x15   :  { %p133_p9 = pnand %p132_p8, %p126_p5 }
  0x16   :  { %v37_v13 = vrot.slane %v36_v11, 2  ;;  %v47_v14 = vadd.f32 %v46_v12, %v45_v10 }
  0x18   :  { %v38_v15 = vadd.f32 %v37_v13, %v36_v11  ;;  %v48_v16 = vrot.slane %v47_v14, 2 }
  0x1a   :  { %v39_v17 = vrot.slane %v38_v15, 1  ;;  %v49_v18 = vadd.f32 %v48_v16, %v47_v14 }
  0x1c   :  { %v40_v19 = vadd.f32 %v39_v17, %v38_v15  ;;  %v50_v20 = vrot.slane %v49_v18, 1 }
  0x1e   :  { %v51_v21 = vadd.f32 %v50_v20, %v49_v18  ;;  %v52_v22 = vmul.f32 0.0625, %v40_v19 }
  0x20   :  { %v53_v23 = vmul.f32 0.0625, %v51_v21  ;;  %v54_v24 = vmul.f32 %v52_v22, %v52_v22 }
  0x22   :  { %v55_v25 = vsub.f32 %v53_v23, %v54_v24 }
  0x24   :  { %v56_v26 = vmax.f32 %v55_v25, 0.0 }
  0x26   :  { %v58_v27 = vadd.f32 1e-05, %v56_v26 }
  0x28   :  { %103 = vrsqrt.f32 %v58_v27 }
  0x35   :  { %v104_v32 = vpop.eup %103 }
  0x36   :  { %v60_v33 = vmul.f32 %v104_v32, %v57_v30 }
  0x38   :  { %v62_v35 = vmul.f32 %v60_v33, %v52_v22  ;;  %v68_v36 = vrot.slane %v60_v33, %v67_v31 }
  0x3a   :  { %v63_v37 = vsub.f32 %v61_v34, %v62_v35  ;;  %v70_v38 = vmul.f32 %v68_v36, %v29_v0  ;;  %v71_v39 = vmul.f32 %v68_v36, %v30_v1 }
  0x3c   :  { %v76_v40 = vrot.slane %v63_v37, %v67_v31 }
  0x3e   :  { %v78_v41 = vadd.f32 %v76_v40, %v70_v38  ;;  %v79_v42 = vadd.f32 %v76_v40, %v71_v39 }
  0x40   :  { %80 = vst.msk [vmem:[#allocation5] sm:$0xff] %vm31_vm0, %v78_v41  ;;  %81 = vst.msk [vmem:[#allocation5 + $0x8] sm:$0xff] %vm31_vm0, %v79_v42 }
  0x41   :  { %136 = shalt.err (!%p133_p9)
}
  0x42   :  { %93 = dma.vmem_to_hbm [thread:$0]  %s88_s23, 256, %s200_s3, [#allocation4], %s150_s15, %s150_s15, %s151_s16  }
  0x43   :  { %147 = dma.done.wait [#allocation4], 256  }
  0x44   :  { %148 = vsyncadd [#allocation4], 4294967040 }
  0x45   :  { %97 = vsyncpa [#allocation3], 1 }
  0x46   :  { %98 = vsyncpa [#allocation4], 1 }

</bundles_post_ra>
